<compile_context>
chip_gen: v6e
topology: v6e:2x2x1
jax: 0.10.0
libtpu: 0.0.40
codegen_flags: <defaults>
</compile_context>

<pallas_src>
import numpy as np

import jax
import jax.numpy as jnp
from jax.experimental import pallas as pl
from jax.experimental.pallas import tpu as pltpu

LANE = 128


def _round_up(v, m):
    return (v + m - 1) // m * m


def _round_down_lane(v):
    return max(LANE, (v // LANE) * LANE)


def _vmem_limit_bytes():
    """~75% of physical VMEM: 48 MiB on v7x (64 MiB), 96 MiB on v5e/v6e (128 MiB)."""
    phys = 64 * 1024 * 1024  # conservative default (v7x)
    try:
        info_fn = getattr(pltpu, "get_tpu_info", None)
        if info_fn is not None:
            phys = int(getattr(info_fn(), "vmem_capacity_bytes", phys)) or phys
    except Exception:
        pass
    return (phys * 3) // 4


def _plan(n, nhid, nout, tm, tk, stream_dtype):
    """Pick tile sizes and padded shapes under the per-generation VMEM budget."""
    sbytes = np.dtype(stream_dtype).itemsize
    hpad = _round_up(nhid, LANE)
    opad = _round_up(nout, LANE)
    vmem_limit = _vmem_limit_bytes()

    n128 = _round_up(n, LANE)
    tm = _round_down_lane(min(tm, n128))
    # v7x megacore: keep >= 2 row tiles so the "parallel" axis spans both TCs.
    while tm > LANE and n128 // tm < 2:
        tm = _round_down_lane(tm // 2)

    tk = _round_down_lane(min(tk, n128))
    # Cap zero-padding waste from rounding the K axis up to tk (<= ~12.5%).
    while tk > LANE and (_round_up(n, tk) - n) > max(n // 8, LANE):
        tk = _round_down_lane(tk // 2)

    def vmem_bytes(tm_, tk_):
        adj = 2 * tm_ * tk_ * sbytes    # double-buffered adj stream
        s1 = 2 * tk_ * hpad * sbytes    # streamed (x @ W1) K-rows
        w2 = 2 * hpad * opad * 4        # resident W2 (worst case 2 buffers)
        out = 2 * tm_ * opad * 4        # output tile
        acc = tm_ * hpad * 4            # f32 accumulator scratch (layer 1)
        return adj + s1 + w2 + out + acc

    budget = (vmem_limit * 9) // 10
    while tk > LANE and vmem_bytes(tm, tk) > budget:
        tk = _round_down_lane(tk // 2)
    while tm > LANE and vmem_bytes(tm, tk) > budget:
        tm = _round_down_lane(tm // 2)

    n_row_pad = _round_up(n, tm)
    n_col_pad = _round_up(n, tk)
    return tm, tk, n_row_pad, n_col_pad, hpad, opad, vmem_limit


def prepare_adj(adj, nhid, nout, *, tm=512, tk=2048, stream_dtype=jnp.bfloat16):
    """Pad + cast adj once for reuse across repeated gcn_forward calls."""
    n = adj.shape[0]
    _, _, n_row_pad, n_col_pad, _, _, _ = _plan(n, nhid, nout, tm, tk, stream_dtype)
    return jnp.zeros((n_row_pad, n_col_pad), stream_dtype).at[:n, :n].set(
        adj.astype(stream_dtype))


# --------------------------------------------------------------------------- #
# Kernels
# --------------------------------------------------------------------------- #
def _xw_kernel(x_ref, w_ref, o_ref):
    """Prepass: s1 row tile = x row tile @ W1 (lane-dense, cast to stream dtype)."""
    o_ref[...] = jnp.dot(x_ref[...], w_ref[...],
                         preferred_element_type=jnp.float32).astype(o_ref.dtype)


def _gc_layer1_kernel(adj_ref, s1_ref, w2_ref, s2_ref, acc_ref):
    """Row tile i, K tile k of:  s2 = relu(adj @ s1) @ W2."""
    k = pl.program_id(1)

    @pl.when(k == 0)
    def _():
        acc_ref[...] = jnp.zeros_like(acc_ref)

    acc_ref[...] += jnp.dot(adj_ref[...], s1_ref[...],
                            preferred_element_type=jnp.float32)

    @pl.when(k == pl.num_programs(1) - 1)
    def _():
        h = jnp.maximum(acc_ref[...], 0.0)  # F.relu
        s2_ref[...] = jnp.dot(h, w2_ref[...],
                              preferred_element_type=jnp.float32).astype(s2_ref.dtype)


def _gc_layer2_kernel(adj_ref, s2_ref, out_ref):
    """Row tile i, K tile k of:  out = adj @ s2 (accumulate directly in f32 out)."""
    k = pl.program_id(1)

    @pl.when(k == 0)
    def _():
        out_ref[...] = jnp.zeros_like(out_ref)

    out_ref[...] += jnp.dot(adj_ref[...], s2_ref[...],
                            preferred_element_type=jnp.float32)


# --------------------------------------------------------------------------- #
# Wrapper
# --------------------------------------------------------------------------- #
def gcn_forward(x, adj, w1, w2, *, tm=512, tk=2048, stream_dtype=jnp.bfloat16):
    """Two-layer GCN forward (dropout=0.0 -> identity, bias=False).

    adj / intermediates stream in `stream_dtype` (default bfloat16, f32
    accumulation; two roundings: adj and the x@W1 / relu(...)@W2 intermediates).
    Use stream_dtype=jnp.float32 for the exact f32 path.  `adj` may be a raw
    (n, n) matrix or the output of prepare_adj() (skips the pad/cast).
    """
    n, nfeat = x.shape
    nhid = w1.shape[1]
    nout = w2.shape[1]
    assert w1.shape == (nfeat, nhid) and w2.shape == (nhid, nout)

    tm, tk, n_row_pad, n_col_pad, hpad, opad, vmem_limit = _plan(
        n, nhid, nout, tm, tk, stream_dtype)
    gi, gk = n_row_pad // tm, n_col_pad // tk
    sbytes = np.dtype(stream_dtype).itemsize
    f32 = jnp.float32

    # adj: reuse pre-prepared padded/cast matrix if supplied, else pad + cast.
    if adj.shape == (n_row_pad, n_col_pad) and adj.dtype == stream_dtype:
        adj_p = adj
    else:
        assert adj.shape == (n, n)
        adj_p = jnp.zeros((n_row_pad, n_col_pad), stream_dtype).at[:n, :n].set(
            adj.astype(stream_dtype))

    x_p = jnp.zeros((n_col_pad, nfeat), f32).at[:n, :].set(x.astype(f32))
    w1_p = jnp.zeros((nfeat, hpad), f32).at[:, :nhid].set(w1.astype(f32))
    w2_p = jnp.zeros((hpad, opad), f32).at[:nhid, :nout].set(w2.astype(f32))

    compiler_params = pltpu.CompilerParams(
        dimension_semantics=("parallel", "arbitrary"),  # rows shard across TCs
        vmem_limit_bytes=vmem_limit)

    # ---- prepass: s1 = x @ W1 (once, lane-dense, stream_dtype) ----
    tr = 512 if n_col_pad % 512 == 0 else (256 if n_col_pad % 256 == 0 else LANE)
    tr = min(tr, n_col_pad)
    s1 = pl.pallas_call(
        _xw_kernel,
        out_shape=jax.ShapeDtypeStruct((n_col_pad, hpad), stream_dtype),
        grid_spec=pltpu.PrefetchScalarGridSpec(
            num_scalar_prefetch=0,
            grid=(n_col_pad // tr,),
            in_specs=[pl.BlockSpec((tr, nfeat), lambda i: (i, 0)),
                      pl.BlockSpec((nfeat, hpad), lambda i: (0, 0))],
            out_specs=pl.BlockSpec((tr, hpad), lambda i: (i, 0))),
        compiler_params=pltpu.CompilerParams(
            dimension_semantics=("parallel",), vmem_limit_bytes=vmem_limit),
        cost_estimate=pl.CostEstimate(
            flops=int(2 * n_col_pad * nfeat * hpad), transcendentals=0,
            bytes_accessed=int(n_col_pad * nfeat * 4 + nfeat * hpad * 4
                               + n_col_pad * hpad * sbytes)),
    )(x_p, w1_p)

    adj_bytes = n_row_pad * n_col_pad * sbytes

    # ---- layer 1 (+ folded W2):  s2 = relu(adj @ s1) @ W2 ----
    cost1 = pl.CostEstimate(
        flops=int(2 * n_row_pad * n_col_pad * hpad + 2 * n_row_pad * hpad * opad),
        transcendentals=0,
        bytes_accessed=int(adj_bytes + gi * n_col_pad * hpad * sbytes
                           + hpad * opad * 4 + n_row_pad * opad * sbytes))
    s2 = pl.pallas_call(
        _gc_layer1_kernel,
        out_shape=jax.ShapeDtypeStruct((n_row_pad, opad), stream_dtype),
        grid_spec=pltpu.PrefetchScalarGridSpec(
            num_scalar_prefetch=0,
            grid=(gi, gk),
            in_specs=[
                pl.BlockSpec((tm, tk), lambda i, k: (i, k)),       # adj (stream)
                pl.BlockSpec((tk, hpad), lambda i, k: (k, 0)),     # s1 K-rows
                pl.BlockSpec((hpad, opad), lambda i, k: (0, 0)),   # W2 (resident)
            ],
            out_specs=pl.BlockSpec((tm, opad), lambda i, k: (i, 0)),
            scratch_shapes=[pltpu.VMEM((tm, hpad), jnp.float32)],
        ),
        compiler_params=compiler_params,
        cost_estimate=cost1,
    )(adj_p, s1, w2_p)

    # Re-pad the intermediate to the K-axis padding for layer 2 (rows beyond n
    # are exact zeros because the padded adj rows are zero).
    if n_col_pad > n_row_pad:
        s2_p = jnp.zeros((n_col_pad, opad), stream_dtype).at[:n_row_pad].set(s2)
    elif n_col_pad < n_row_pad:
        s2_p = s2[:n_col_pad]
    else:
        s2_p = s2

    # ---- layer 2:  out = adj @ s2 ----
    cost2 = pl.CostEstimate(
        flops=int(2 * n_row_pad * n_col_pad * opad),
        transcendentals=0,
        bytes_accessed=int(adj_bytes + gi * n_col_pad * opad * sbytes
                           + n_row_pad * opad * 4))
    out_p = pl.pallas_call(
        _gc_layer2_kernel,
        out_shape=jax.ShapeDtypeStruct((n_row_pad, opad), jnp.float32),
        grid_spec=pltpu.PrefetchScalarGridSpec(
            num_scalar_prefetch=0,
            grid=(gi, gk),
            in_specs=[
                pl.BlockSpec((tm, tk), lambda i, k: (i, k)),     # adj (stream)
                pl.BlockSpec((tk, opad), lambda i, k: (k, 0)),   # s2 K-rows
            ],
            out_specs=pl.BlockSpec((tm, opad), lambda i, k: (i, 0)),
        ),
        compiler_params=compiler_params,
        cost_estimate=cost2,
    )(adj_p, s2_p)

    return out_p[:n, :nout]


def init_gc_weight(key, in_features, out_features):
    """Matches GraphConvolution.reset_parameters: U(-r, r), r = sqrt(6/(fin+fout))."""
    r = np.sqrt(6.0 / (in_features + out_features))
    return jax.random.uniform(
        key, (in_features, out_features), jnp.float32, minval=-r, maxval=r)


if __name__ == "__main__":
    # Small shapes consistent with the module: N nodes, nfeat -> nhid1 -> nout.
    N, NFEAT, NHID1, NOUT = 384, 48, 16, 8

    key = jax.random.PRNGKey(0)
    kx, kadj, kw1, kw2 = jax.random.split(key, 4)

    x = jax.random.normal(kx, (N, NFEAT), jnp.float32)

    # Deterministic dense "normalized adjacency"-like matrix.
    a = jax.random.uniform(kadj, (N, N), jnp.float32)
    a = (a > 0.8).astype(jnp.float32) + jnp.eye(N, dtype=jnp.float32)
    adj = a / jnp.sum(a, axis=1, keepdims=True)  # row-normalize

    w1 = init_gc_weight(kw1, NFEAT, NHID1)
    w2 = init_gc_weight(kw2, NHID1, NOUT)

    # Exact f32 path with small tiles to exercise the 3x3 multi-tile
    # accumulation grid; bf16 default path exercises the planner (production
    # defaults tm=512, tk=2048, auto-shrunk for small N / v7x megacore).
    out_f32 = gcn_forward(x, adj, w1, w2, tm=128, tk=128,
                          stream_dtype=jnp.float32)
    out_bf16 = gcn_forward(x, adj, w1, w2)
    out_f32 = jax.block_until_ready(out_f32)
    out_bf16 = jax.block_until_ready(out_bf16)

    # Float64 host reference of the same math (dropout=0 -> identity).
    an = np.asarray(adj, np.float64)
    xn = np.asarray(x, np.float64)
    w1n = np.asarray(w1, np.float64)
    w2n = np.asarray(w2, np.float64)
    ref = an @ (np.maximum(an @ (xn @ w1n), 0.0) @ w2n)

    np.testing.assert_allclose(np.asarray(out_f32), ref, rtol=1e-2, atol=1e-3)
    # bf16-streamed adjacency + intermediates: looser tolerance (documented).
    np.testing.assert_allclose(np.asarray(out_bf16), ref, rtol=3e-2, atol=5e-3)

    print("KERNEL_OK")
</pallas_src>

<mosaic_0001>
module attributes {stable_mosaic.version = 11 : i64} {
  func.func @_xw_kernel(%arg0: i32, %arg1: memref<128x48xf32, #tpu.memory_space<vmem>>, %arg2: memref<48x128xf32, #tpu.memory_space<vmem>>, %arg3: memref<128x128xf32, #tpu.memory_space<vmem>>) attributes {dimension_semantics = [#tpu.dimension_semantics<parallel>], iteration_bounds = array<i64: 3>, scalar_prefetch = 0 : i64, scratch_operands = 0 : i64, tpu.core_type = #tpu.core_type<tc>, window_params = [{transform_indices = @transform_0, window_bounds = array<i64: 128, 48>}, {pipeline_mode = #tpu.pipeline_mode<synchronous>, transform_indices = @transform_1, window_bounds = array<i64: 48, 128>}, {transform_indices = @transform_2, window_bounds = array<i64: 128, 128>}]} {
    %c0 = arith.constant 0 : index
    %c0_0 = arith.constant 0 : index
    %0 = vector.load %arg1[%c0, %c0_0] : memref<128x48xf32, #tpu.memory_space<vmem>>, vector<128x48xf32>
    %c0_1 = arith.constant 0 : index
    %c0_2 = arith.constant 0 : index
    %1 = vector.load %arg2[%c0_1, %c0_2] : memref<48x128xf32, #tpu.memory_space<vmem>>, vector<48x128xf32>
    %cst = arith.constant dense<0.000000e+00> : vector<128x128xf32>
    %2 = tpu.matmul %0, %1, %cst {dimension_numbers = #tpu.dot_dimension_numbers<[1], [0], [0], [1], [0, 0, 1, 1], [], []>} : vector<128x48xf32>, vector<48x128xf32>, vector<128x128xf32> -> vector<128x128xf32>
    %c0_3 = arith.constant 0 : index
    %c0_4 = arith.constant 0 : index
    %3 = vector.load %arg3[%c0_3, %c0_4] : memref<128x128xf32, #tpu.memory_space<vmem>>, vector<128x128xf32>
    tpu.vector_store %arg3[%c0_3, %c0_4], %2 {strides = array<i32>} : memref<128x128xf32, #tpu.memory_space<vmem>>, vector<128x128xf32>,
    return
  }
  func.func @transform_0(%arg0: i32) -> (i32, i32) {
    %c0_i32 = arith.constant 0 : i32
    %c0_i32_0 = arith.constant 0 : i32
    return %arg0, %c0_i32 : i32, i32
  }
  func.func @transform_1(%arg0: i32) -> (i32, i32) {
    %c0_i32 = arith.constant 0 : i32
    %c0_i32_0 = arith.constant 0 : i32
    %c0_i32_1 = arith.constant 0 : i32
    return %c0_i32, %c0_i32_0 : i32, i32
  }
  func.func @transform_2(%arg0: i32) -> (i32, i32) {
    %c0_i32 = arith.constant 0 : i32
    %c0_i32_0 = arith.constant 0 : i32
    return %arg0, %c0_i32 : i32, i32
  }
}

</mosaic_0001>

<bundles_post_ra>
// kernel: tpu_custom_call.1
= control target key start
LH: loop header
LB: loop body
LE: loop exit
PB: predicated region body
PF: predicated region fallthrough
CT: control target
= control target key end

     0   :  { %7 = vsyncpa [#allocation3], 0  ;;  %s849_s0 = inlined_call_operand.vmem [shape: f32[384,48], index: 0, kind: input, shape index: {}]   ;;  %s850_s1 = inlined_call_operand.vmem [shape: f32[48,128], index: 1, kind: input, shape index: {}]   ;;  %s851_s2 = inlined_call_operand.hbm [shape: f32[384,128], index: 2, kind: output, shape index: {}]  }
   0x1   :  { %9 = vsyncpa [#allocation3 + $0x1], 0  ;;  %s673_s9 = smov 0   ;;  %s675_s10 = smov 0  }
   0x2   :  { %s677_s11 = smov 0   ;;  %s679_s12 = smov 0  }
   0x3 LB: > { %s694_s13 = sadd.s32 4294967295, %s653_s12   ;;  %s453_s14 = sadd.s32 4294967294, %s653_s12   ;;  %s653_s12 = sphi %s679_s12, %s857_s12   ;;  %s649_s11 = sphi %s677_s11, %s856_s11   ;;  %s645_s10 = sphi %s675_s10, %s855_s10   ;;  %s641_s9 = sphi %s673_s9, %s854_s9  }
   0x4   : > { %s698_s15 = sadd.s32 1, %s653_s12   ;;  %s69_s16 = sadd.s32 1, %s649_s11 }
   0x5   : > { %s66_s17 = ssub.s32 %s653_s12, %s698_s15  ;;  %p79_p0 = scmp.ne.s32.totalorder %s649_s11, %s645_s10 }
   0x6   : > { %p67_p1 = scmp.eq.s32.totalorder %s66_s17, 0  ;;  %p80_p2 = scmp.eq.s32.totalorder %s694_s13, 2 }
   0x7   : > { %p85_p3 = scmp.ne.s32.totalorder %s645_s10, %s641_s9  ;;  %p86_p4 = scmp.eq.s32.totalorder %s453_s14, 2 }
   0x8   : > { %s709_s18 = scalar_select %p67_p1, %s649_s11, %s69_s16  }
   0x9   : > { %p711_p5 = por %p80_p2, %p79_p0  ;;  %p715_p6 = por %p86_p4, %p85_p3 }
   0xa   : > { %p456_p7 = scmp.ge.s32.totalorder %s653_s12, 1  ;;  %p116_p8 = scmp.lt.s32.totalorder %s653_s12, 4 }
   0xc   : > { %p117_p9 = pnand %p456_p7, %p116_p8 }
   0xd   : > { %s458_s25 = sshll.u32 (!%p117_p9), %s694_s13, 4  ;;  %s135_s16 = sand.u32 (!%p117_p9), 1, %s645_s10  }
   0xe   : > { %120 = sbr.rel (%p117_p9) target bundleno = 254 (0xfe), region = 28  ;;  %p139_p10 = scmp.lt.s32.totalorder (!%p117_p9), %s458_s25, 47 }
   0xf   : > { %s457_s17 = sshll.u32 (!%p117_p9), %s135_s16, 7  ;;  %s481_s22 = sshll.u32 (!%p117_p9), %s694_s13, 11 }
  0x10   : > { %s780_s21 = scalar_lea.vmem (!%p117_p9), [#allocation2], %s457_s17  ;;  %s799_s26 = scalar_lea.hbm (!%p117_p9), %s851_s2, %s481_s22 }
  0x11   : > { %s391_s23 = sshll.u32 (!%p117_p9), %s780_s21, 4  ;;  %s809_s13 = scalar_lea.sflag (!%p117_p9), [#allocation3], %s135_s16  ;;  %s801_s23 = int_to_ptr.vmem [resolvable:$true] %s391_s23 }
  0x12   : > { %s593_s27 = scalar_lea.vmem (!%p117_p9), %s801_s23, 2048  ;;  %s655_s28 = smov (!%p117_p9), [#allocation2]  }
  0x13   : > { %v166_v0 = vld [vmem:[%s850_s1 + $0x28] sm:$0xff]  ;;  %v165_v1 = vld [vmem:[%s850_s1 + $0x20] sm:$0xff]  ;;  %v164_v2 = vld [vmem:[%s850_s1 + $0x18] sm:$0xff]  ;;  %s859_s25 = smov (!%p139_p10, %s458_s25), 47  ;;  %vm167_vm0 = vcmask 392192   ;;  %p594_p11 = scmp.ne.s32.totalorder %s801_s23, %s593_s27 }
  0x14   : > { %504 = vmatprep.subr.mxu0 %v166_v0  ;;  %540 = vmatprep.subr.mxu1 %v166_v0  ;;  %v163_v3 = vld [vmem:[%s850_s1 + $0x10] sm:$0xff]  ;;  %s459_s30 = sshll.u32 %s859_s25, 3  ;;  %v162_v4 = vld [vmem:[%s850_s1 + $0x8] sm:$0xff]  ;;  %v161_v5 = vld [vmem:[%s850_s1] sm:$0xff]  ;;  %s597_s29 = sshll.u32 %s655_s28, 4  ;;  %s598_s29 = int_to_ptr.vmem [resolvable:$false] %s597_s29 }
  0x15   : > { %505 = vmatpush3.msra.mxu0 %v166_v0  ;;  %546 = vmatpush3.msra.mxu1 %v166_v0  ;;  %s740_s7 = scalar_lea.vmem %s849_s0, %s459_s30  ;;  %p595_p12 = pnand %p594_p11, %p711_p5 }
  0x16   : > { %506 = vmatprep.subr.mxu0 %v165_v1  ;;  %541 = vmatprep.subr.mxu1 %v165_v1  ;;  %v145_v6 = vld [vmem:[%s740_s7] sm:$0xff]  ;;  %v146_v8 = vld [vmem:[%s740_s7 + $0x8] sm:$0xff]  ;;  %v147_v10 = vld [vmem:[%s740_s7 + $0x10] sm:$0xff]  ;;  %s599_s30 = scalar_lea.vmem %s598_s29, 4096  ;;  %p600_p0 = scmp.lt.s32.totalorder %s801_s23, %s598_s29 }
  0x17   : > { %507 = vmatpush3.msra.mxu0 %v165_v1  ;;  %547 = vmatpush3.msra.mxu1 %v165_v1  ;;  %v153_v7 = vld [vmem:[%s740_s7 + $0x40] sm:$0xff]  ;;  %v154_v9 = vld [vmem:[%s740_s7 + $0x48] sm:$0xff]  ;;  %v155_v11 = vld [vmem:[%s740_s7 + $0x50] sm:$0xff]  ;;  %p596_p13 = pneg %p595_p12  ;;  %p601_p1 = scmp.lt.s32.totalorder %s599_s30, %s593_s27 }
  0x18   : > { %508 = vmatprep.subr.mxu0 %v164_v2  ;;  %542 = vmatprep.subr.mxu1 %v164_v2  ;;  %v148_v12 = vld [vmem:[%s740_s7 + $0x18] sm:$0xff]  ;;  %v149_v14 = vld [vmem:[%s740_s7 + $0x20] sm:$0xff]  ;;  %v150_v16 = vld [vmem:[%s740_s7 + $0x28] sm:$0xff] }
  0x19   : > { %509 = vmatpush3.msra.mxu0 %v164_v2  ;;  %548 = vmatpush3.msra.mxu1 %v164_v2  ;;  %v156_v13 = vld [vmem:[%s740_s7 + $0x58] sm:$0xff]  ;;  %v157_v15 = vld [vmem:[%s740_s7 + $0x60] sm:$0xff]  ;;  %v158_v17 = vld [vmem:[%s740_s7 + $0x68] sm:$0xff]  ;;  %p602_p2 = por %p601_p1, %p600_p0 }
  0x1a   : > { %510 = vmatprep.subr.mxu0 %v163_v3  ;;  %543 = vmatprep.subr.mxu1 %v163_v3  ;;  %v151_v18 = vld [vmem:[%s740_s7 + $0x30] sm:$0xff]  ;;  %v152_v20 = vld [vmem:[%s740_s7 + $0x38] sm:$0xff] }
  0x1b   : > { %511 = vmatpush3.msra.mxu0 %v163_v3  ;;  %549 = vmatpush3.msra.mxu1 %v163_v3  ;;  %v159_v19 = vld [vmem:[%s740_s7 + $0x70] sm:$0xff]  ;;  %v160_v21 = vld [vmem:[%s740_s7 + $0x78] sm:$0xff]  ;;  %p603_p3 = pnand %p602_p2, %p596_p13 }
  0x1c   : > { %512 = vmatprep.subr.mxu0 %v162_v4  ;;  %544 = vmatprep.subr.mxu1 %v162_v4 }
  0x1d   : > { %513 = vmatpush3.msra.mxu0 %v162_v4  ;;  %550 = vmatpush3.msra.mxu1 %v162_v4 }
  0x1e   : > { %514 = vmatprep.subr.mxu0 %v161_v5  ;;  %545 = vmatprep.subr.mxu1 %v161_v5 }
  0x1f   : > { %515 = vmatpush3.msra.mxu0 %v161_v5  ;;  %551 = vmatpush3.msra.mxu1 %v161_v5 }
  0x20   : > { %516 = vmatprep.mubr.msk.f32.mxu0 %vm167_vm0, %v145_v6  ;;  %528 = vmatprep.mubr.msk.f32.mxu1 %vm167_vm0, %v153_v7 }
  0x21   : > { %517 = vmatmul.mubr.msk.f32.vlgmr.msra.gmra.mxu0 %vm167_vm0, %v146_v8  ;;  %529 = vmatmul.mubr.msk.f32.vlgmr.msra.gmra.mxu1 %vm167_vm0, %v154_v9 }
  0x22   : > { %519 = vmatprep.mubr.msk.f32.mxu0 %vm167_vm0, %v147_v10  ;;  %531 = vmatprep.mubr.msk.f32.mxu1 %vm167_vm0, %v155_v11 }
  0x25   : > { %520 = vmatmul.mubr.msk.f32.gmra.mxu0 %vm167_vm0, %v148_v12  ;;  %532 = vmatmul.mubr.msk.f32.gmra.mxu1 %vm167_vm0, %v156_v13 }
  0x26   : > { %522 = vmatprep.mubr.msk.f32.mxu0 %vm167_vm0, %v149_v14  ;;  %534 = vmatprep.mubr.msk.f32.mxu1 %vm167_vm0, %v157_v15 }
  0x29   : > { %523 = vmatmul.mubr.msk.f32.gmra.mxu0 %vm167_vm0, %v150_v16  ;;  %535 = vmatmul.mubr.msk.f32.gmra.mxu1 %vm167_vm0, %v158_v17 }
  0x2a   : > { %525 = vmatprep.mubr.msk.f32.mxu0 %vm167_vm0, %v151_v18  ;;  %537 = vmatprep.mubr.msk.f32.mxu1 %vm167_vm0, %v159_v19 }
  0x2d   : > { %526 = vmatmul.mubr.msk.f32.gmra.mxu0 %vm167_vm0, %v152_v20  ;;  %538 = vmatmul.mubr.msk.f32.gmra.mxu1 %vm167_vm0, %v160_v21 }
  0xe1   : > { %v518_v22 = vpop.f32.mrf.mxu0  ;;  %v530_v23 = vpop.f32.mrf.mxu1 }
  0xe2   : > { %362 = vst [vmem:[%s780_s21 + $0x8] sm:$0xff] %v518_v22  ;;  %370 = vst [vmem:[%s780_s21 + $0x48] sm:$0xff] %v530_v23 }
  0xe3   : > { %v282_v24 = vpop.f32.mrf.mxu0  ;;  %v322_v25 = vpop.f32.mrf.mxu1 }
  0xe4   : > { %361 = vst [vmem:[%s780_s21] sm:$0xff] %v282_v24  ;;  %369 = vst [vmem:[%s780_s21 + $0x40] sm:$0xff] %v322_v25 }
  0xe5   : > { %v521_v26 = vpop.f32.mrf.mxu0  ;;  %v533_v27 = vpop.f32.mrf.mxu1 }
  0xe6   : > { %364 = vst [vmem:[%s780_s21 + $0x18] sm:$0xff] %v521_v26  ;;  %372 = vst [vmem:[%s780_s21 + $0x58] sm:$0xff] %v533_v27 }
  0xe7   : > { %v292_v28 = vpop.f32.mrf.mxu0  ;;  %v332_v29 = vpop.f32.mrf.mxu1 }
  0xe8   : > { %363 = vst [vmem:[%s780_s21 + $0x10] sm:$0xff] %v292_v28  ;;  %371 = vst [vmem:[%s780_s21 + $0x50] sm:$0xff] %v332_v29 }
  0xe9   : > { %v524_v30 = vpop.f32.mrf.mxu0  ;;  %v536_v31 = vpop.f32.mrf.mxu1 }
  0xea   : > { %366 = vst [vmem:[%s780_s21 + $0x28] sm:$0xff] %v524_v30  ;;  %374 = vst [vmem:[%s780_s21 + $0x68] sm:$0xff] %v536_v31 }
  0xeb   : > { %v302_v32 = vpop.f32.mrf.mxu0  ;;  %v342_v33 = vpop.f32.mrf.mxu1 }
  0xec   : > { %365 = vst [vmem:[%s780_s21 + $0x20] sm:$0xff] %v302_v32  ;;  %373 = vst [vmem:[%s780_s21 + $0x60] sm:$0xff] %v342_v33 }
  0xed   : > { %v527_v34 = vpop.f32.mrf.mxu0  ;;  %v539_v35 = vpop.f32.mrf.mxu1 }
  0xee   : > { %368 = vst [vmem:[%s780_s21 + $0x38] sm:$0xff] %v527_v34  ;;  %376 = vst [vmem:[%s780_s21 + $0x78] sm:$0xff] %v539_v35 }
  0xef   : > { %v312_v36 = vpop.f32.mrf.mxu0  ;;  %v352_v37 = vpop.f32.mrf.mxu1 }
  0xf0   : > { %367 = vst [vmem:[%s780_s21 + $0x30] sm:$0xff] %v312_v36  ;;  %375 = vst [vmem:[%s780_s21 + $0x70] sm:$0xff] %v352_v37 }
  0xf1   : > { %606 = shalt.err (!%p603_p3)
}
  0xf2   : > { %s607_s3 = scalar_lea.hbm %s799_s26, 2048  ;;  %s611_s6 = scalar_lea.hbm %s851_s2, 6144 }
  0xf3   : > { %p608_p4 = scmp.ne.s32.totalorder %s799_s26, %s607_s3  ;;  %p612_p9 = scmp.lt.s32.totalorder %s799_s26, %s851_s2 }
  0xf4   : > { %p613_p10 = scmp.lt.s32.totalorder %s611_s6, %s607_s3 }
  0xf5   : > { %p609_p7 = pnand %p608_p4, %p711_p5 }
  0xf6   : > { %p614_p11 = por %p613_p10, %p612_p9 }
  0xf7   : > { %p610_p8 = pneg %p609_p7 }
  0xf9   : > { %p615_p12 = pnand %p614_p11, %p610_p8 }
  0xfb   : > { %618 = shalt.err (!%p615_p12)
}
  0xfc   : > { %s656_s14 = smov 128   ;;  %s657_s16 = smov 8  }
  0xfd   : > { %552 = dma.vmem_to_hbm [thread:$0]  (%p711_p5), %s801_s23, 2048, %s799_s26, %s809_s13, %s656_s14, %s656_s14, %s657_s16  }
  0xfe PF: > { %p558_p13 = scmp.ge.s32.totalorder %s653_s12, 2  ;;  %s406_s17 = sand.u32 1, %s641_s9  }
  0xff   : > { %s407_s21 = scalar_lea.sflag [#allocation3], %s406_s17 }
 0x100   : > { %p555_p0 = pnand %p558_p13, %p715_p6 }
 0x102   : > { %p556_p1 = pneg %p555_p0 }
 0x104   : > { %636 = dma.done.wait (%p556_p1), %s407_s21, 2048  }
 0x105   : > { %638 = vsyncadd (%p556_p1), %s407_s21, 4294965248  ;;  %p12_p2 = scmp.ge.s32.totalorder %s698_s15, 5   ;;  %s854_s9 = smov %s645_s10 }
 0x106   : > { %s855_s10 = smov %s649_s11  ;;  %s856_s11 = smov %s709_s18 }
 0x107   : > { %s857_s12 = smov %s698_s15  ;;  %14 = sbr.rel (!%p12_p2) target bundleno = 3 (0x3), region = 63 }
 0x10c   :  { %412 = vsyncpa [#allocation3], 1 }
 0x10d   :  { %414 = vsyncpa [#allocation3 + $0x1], 1 }

</bundles_post_ra>
